<compile_context>
chip_gen: v7x
topology: tpu7x:2x2x1
jax: 0.10.0
libtpu: 0.0.40
codegen_flags: <defaults>
</compile_context>

<pallas_src>
import jax
import jax.numpy as jnp
import numpy as np
from jax.experimental import pallas as pl
from jax.experimental.pallas import tpu as pltpu


def _round_up(v, m):
    return (v + m - 1) // m * m


# -----------------------------------------------------------------------------
# Pallas kernel: one GINEConv layer (edge-tiled reduction) + outer activation
# -----------------------------------------------------------------------------
def gine_conv_kernel(x_ref, e_ref, src_ref, dst_ref,
                     wlin_ref, blin_ref, w1_ref, b1_ref, w2_ref, b2_ref,
                     eps_ref, out_ref, acc_ref):
    k = pl.program_id(0)

    @pl.when(k == 0)
    def _init():
        acc_ref[...] = jnp.zeros_like(acc_ref)

    x = x_ref[...]                                   # [Np, Cin_pad]   (resident)
    e = e_ref[...]                                   # [Et, De_pad]    (this edge tile)
    src = src_ref[...]                               # [Et, 1] int32
    dst = dst_ref[...]                               # [1, Et] int32

    n_pad = x.shape[0]
    e_tile = e.shape[0]

    # GINEConv.lin : project edge features of this tile (computed once per edge)
    e_proj = jnp.dot(e, wlin_ref[...],
                     preferred_element_type=jnp.float32) + blin_ref[...]   # [Et, Cin]

    # gather x_j = x[src] : one-hot built in-kernel (never exists in HBM)
    gather_oh = (jax.lax.broadcasted_iota(jnp.int32, (e_tile, n_pad), 1)
                 == src).astype(jnp.float32)                               # [Et, Np]
    x_j = jnp.dot(gather_oh, x, preferred_element_type=jnp.float32)        # [Et, Cin]

    # message = relu(x_j + lin(edge_attr))
    msg = jnp.maximum(x_j + e_proj, 0.0)                                   # [Et, Cin]

    # scatter-sum over destination nodes : in-kernel one-hot, accumulate in VMEM
    # (padded edges carry dst == Np so their column is all-zero -> no effect)
    scatter_oh = (jax.lax.broadcasted_iota(jnp.int32, (n_pad, e_tile), 0)
                  == dst).astype(jnp.float32)                              # [Np, Et]
    acc_ref[...] += jnp.dot(scatter_oh, msg, preferred_element_type=jnp.float32)

    @pl.when(k == pl.num_programs(0) - 1)
    def _finalize():
        eps = eps_ref[0, 0]                                                # SMEM scalar
        # out = aggregated + (1 + eps) * x
        h = acc_ref[...] + (1.0 + eps) * x                                 # [Np, Cin]
        # GIN MLP: Linear -> relu -> Linear   (norm=None, dropout=0)
        h1 = jnp.maximum(jnp.dot(h, w1_ref[...],
                                 preferred_element_type=jnp.float32) + b1_ref[...], 0.0)
        out = jnp.dot(h1, w2_ref[...],
                      preferred_element_type=jnp.float32) + b2_ref[...]
        # outer activation (applied after every conv, incl. the last one)
        # TODO(synk): outer nn.Dropout is identity here (eval-mode forward).
        out_ref[...] = jnp.maximum(out, 0.0)


def gine_layer_pallas(x_pad, e_pad, src_col, dst_row,
                      Wlin, blin, W1, b1, W2, b2, eps, *, edge_tile):
    n_pad, cin_pad = x_pad.shape
    e_total, de_pad = e_pad.shape
    cout_pad = W2.shape[1]
    num_edge_tiles = e_total // edge_tile

    flops = (2 * e_total * de_pad * cin_pad            # edge projection
             + 4 * e_total * n_pad * cin_pad           # gather + scatter one-hot matmuls
             + 2 * n_pad * cin_pad * cout_pad          # MLP layer 1
             + 2 * n_pad * cout_pad * cout_pad)        # MLP layer 2
    bytes_accessed = 4 * (n_pad * cin_pad + e_total * de_pad + 2 * e_total
                          + de_pad * cin_pad + cin_pad * cout_pad
                          + cout_pad * cout_pad + 3 * cout_pad
                          + n_pad * cout_pad)

    grid_spec = pltpu.PrefetchScalarGridSpec(
        num_scalar_prefetch=0,
        grid=(num_edge_tiles,),
        in_specs=[
            pl.BlockSpec((n_pad, cin_pad), lambda k: (0, 0)),      # x   (resident)
            pl.BlockSpec((edge_tile, de_pad), lambda k: (k, 0)),   # e   (edge tile)
            pl.BlockSpec((edge_tile, 1), lambda k: (k, 0)),        # src (edge tile)
            pl.BlockSpec((1, edge_tile), lambda k: (0, k)),        # dst (edge tile)
            pl.BlockSpec((de_pad, cin_pad), lambda k: (0, 0)),     # Wlin
            pl.BlockSpec((1, cin_pad), lambda k: (0, 0)),          # blin
            pl.BlockSpec((cin_pad, cout_pad), lambda k: (0, 0)),   # W1
            pl.BlockSpec((1, cout_pad), lambda k: (0, 0)),         # b1
            pl.BlockSpec((cout_pad, cout_pad), lambda k: (0, 0)),  # W2
            pl.BlockSpec((1, cout_pad), lambda k: (0, 0)),         # b2
            pl.BlockSpec(memory_space=pltpu.MemorySpace.SMEM),     # eps scalar
        ],
        out_specs=pl.BlockSpec((n_pad, cout_pad), lambda k: (0, 0)),
        scratch_shapes=[pltpu.VMEM((n_pad, cin_pad), jnp.float32)],
    )

    return pl.pallas_call(
        gine_conv_kernel,
        out_shape=jax.ShapeDtypeStruct((n_pad, cout_pad), jnp.float32),
        grid_spec=grid_spec,
        compiler_params=pltpu.CompilerParams(
            dimension_semantics=("arbitrary",)),     # edge axis = reduction
        cost_estimate=pl.CostEstimate(flops=int(flops), transcendentals=0,
                                      bytes_accessed=int(bytes_accessed)),
    )(x_pad, e_pad, src_col, dst_row, Wlin, blin, W1, b1, W2, b2, eps)


# -----------------------------------------------------------------------------
# Pure-JAX reference of the same layer (for a correctness check)
# -----------------------------------------------------------------------------
def gine_layer_ref(x, e, src, dst, Wlin, blin, W1, b1, W2, b2, eps):
    e_proj = e @ Wlin + blin
    msg = jax.nn.relu(x[src] + e_proj)
    agg = jnp.zeros_like(x).at[dst].add(msg)
    h = agg + (1.0 + eps) * x
    h1 = jax.nn.relu(h @ W1 + b1)
    out = h1 @ W2 + b2
    return jax.nn.relu(out)


# -----------------------------------------------------------------------------
# Model wrapper: embed types, concat, pad, run num_convs GINE layers
# -----------------------------------------------------------------------------
def homo_molecule_gnn_gine_forward(params, x, edge_index, ntypes, etypes, eattr,
                                   *, edge_tile=128):
    N = x.shape[0]
    E = eattr.shape[0]

    # type embeddings + concat (glue)
    ntype_embs = params["ntype_emb"][ntypes]                 # [N, ntype_emb_dim]
    x_cat = jnp.concatenate([ntype_embs, x], axis=-1)        # [N, Cin0]
    etype_embs = params["etype_emb"][etypes]                 # [E, etype_emb_dim]
    e_cat = jnp.concatenate([etype_embs, eattr], axis=-1)    # [E, De]

    n_pad = _round_up(N, 8)
    e_pad_len = _round_up(E, edge_tile)
    de = e_cat.shape[1]
    de_pad = _round_up(de, 128)

    e_padded = jnp.pad(e_cat, ((0, e_pad_len - E), (0, de_pad - de)))

    src = edge_index[0].astype(jnp.int32)
    dst = edge_index[1].astype(jnp.int32)
    # padded edges: dst = n_pad (out of range) -> never scatter; src = 0 is harmless
    src_col = jnp.pad(src, (0, e_pad_len - E))[:, None]                          # [Ep, 1]
    dst_row = jnp.pad(dst, (0, e_pad_len - E), constant_values=n_pad)[None, :]   # [1, Ep]

    h = x_cat
    for layer in params["convs"]:
        c_in = layer["W1"].shape[0]
        c_out = layer["W1"].shape[1]
        cin_pad = _round_up(c_in, 128)
        cout_pad = _round_up(c_out, 128)

        h_pad = jnp.pad(h, ((0, n_pad - h.shape[0]), (0, cin_pad - h.shape[1])))
        Wlin_p = jnp.pad(layer["Wlin"], ((0, de_pad - de), (0, cin_pad - c_in)))
        blin_p = jnp.pad(layer["blin"], ((0, 0), (0, cin_pad - c_in)))
        W1_p = jnp.pad(layer["W1"], ((0, cin_pad - c_in), (0, cout_pad - c_out)))
        b1_p = jnp.pad(layer["b1"], ((0, 0), (0, cout_pad - c_out)))
        W2_p = jnp.pad(layer["W2"], ((0, cout_pad - c_out), (0, cout_pad - c_out)))
        b2_p = jnp.pad(layer["b2"], ((0, 0), (0, cout_pad - c_out)))

        out_pad = gine_layer_pallas(h_pad, e_padded, src_col, dst_row,
                                    Wlin_p, blin_p, W1_p, b1_p, W2_p, b2_p,
                                    layer["eps"], edge_tile=edge_tile)
        h = out_pad[:N, :c_out]
    return h


def homo_molecule_gnn_gine_forward_ref(params, x, edge_index, ntypes, etypes, eattr):
    ntype_embs = params["ntype_emb"][ntypes]
    x_cat = jnp.concatenate([ntype_embs, x], axis=-1)
    etype_embs = params["etype_emb"][etypes]
    e_cat = jnp.concatenate([etype_embs, eattr], axis=-1)
    src = edge_index[0]
    dst = edge_index[1]
    h = x_cat
    for layer in params["convs"]:
        h = gine_layer_ref(h, e_cat, src, dst,
                           layer["Wlin"], layer["blin"][0],
                           layer["W1"], layer["b1"][0],
                           layer["W2"], layer["b2"][0],
                           layer["eps"][0, 0])
    return h


# -----------------------------------------------------------------------------
# Deterministic parameter init (shapes mirror the PyTorch module's __init__)
# -----------------------------------------------------------------------------
def init_params(key, *, in_channels, edge_dim, num_ntypes, num_etypes,
                ntype_emb_dim, etype_emb_dim, num_convs, hidden_channels,
                out_channels):
    keys = iter(jax.random.split(key, 64))

    def dense(k, fan_in, fan_out):
        scale = 1.0 / np.sqrt(fan_in)
        return jax.random.uniform(k, (fan_in, fan_out), jnp.float32, -scale, scale)

    params = {
        "ntype_emb": jax.random.normal(next(keys), (num_ntypes, ntype_emb_dim),
                                       jnp.float32),
        "etype_emb": jax.random.normal(next(keys), (num_etypes, etype_emb_dim),
                                       jnp.float32),
        "convs": [],
    }

    edge_dim_total = edge_dim + etype_emb_dim
    node_dims = ([in_channels + ntype_emb_dim]
                 + [hidden_channels] * (num_convs - 1)
                 + [out_channels])

    for i in range(num_convs):
        c_in, c_out = node_dims[i], node_dims[i + 1]
        layer = {
            # GINEConv.lin : Linear(edge_dim_total, c_in)
            "Wlin": dense(next(keys), edge_dim_total, c_in),
            "blin": jax.random.uniform(next(keys), (1, c_in), jnp.float32, -0.1, 0.1),
            # GIN MLP: Linear(c_in, c_out) -> relu -> Linear(c_out, c_out)
            "W1": dense(next(keys), c_in, c_out),
            "b1": jax.random.uniform(next(keys), (1, c_out), jnp.float32, -0.1, 0.1),
            "W2": dense(next(keys), c_out, c_out),
            "b2": jax.random.uniform(next(keys), (1, c_out), jnp.float32, -0.1, 0.1),
            # trainable eps, initialized at 0.0 (GINEConv default)
            "eps": jnp.zeros((1, 1), jnp.float32),
        }
        params["convs"].append(layer)
    return params


# -----------------------------------------------------------------------------
if __name__ == "__main__":
    # module hyper-params (small but representative)
    in_channels = 16
    edge_dim = 8
    num_ntypes = 5
    num_etypes = 4
    ntype_emb_dim = 16
    etype_emb_dim = 8
    num_convs = 2
    hidden_channels = 32
    out_channels = 16

    N = 32   # nodes
    E = 64   # edges

    key = jax.random.PRNGKey(0)
    k_param, k_x, k_e, k_nt, k_et, k_src, k_dst = jax.random.split(key, 7)

    params = init_params(
        k_param,
        in_channels=in_channels, edge_dim=edge_dim,
        num_ntypes=num_ntypes, num_etypes=num_etypes,
        ntype_emb_dim=ntype_emb_dim, etype_emb_dim=etype_emb_dim,
        num_convs=num_convs, hidden_channels=hidden_channels,
        out_channels=out_channels,
    )

    x = jax.random.normal(k_x, (N, in_channels), jnp.float32)
    eattr = jax.random.normal(k_e, (E, edge_dim), jnp.float32)
    ntypes = jax.random.randint(k_nt, (N,), 0, num_ntypes)
    etypes = jax.random.randint(k_et, (E,), 0, num_etypes)
    src = jax.random.randint(k_src, (E,), 0, N)
    dst = jax.random.randint(k_dst, (E,), 0, N)
    edge_index = jnp.stack([src, dst], axis=0)           # [2, E]

    out = homo_molecule_gnn_gine_forward(params, x, edge_index, ntypes, etypes, eattr)
    out = jax.block_until_ready(out)

    ref = homo_molecule_gnn_gine_forward_ref(params, x, edge_index, ntypes, etypes, eattr)
    ref = jax.block_until_ready(ref)

    np.testing.assert_allclose(np.asarray(out), np.asarray(ref), rtol=1e-4, atol=1e-4)
    assert out.shape == (N, out_channels)

    print("KERNEL_OK")
</pallas_src>

<mosaic_0001>
module attributes {stable_mosaic.version = 11 : i64} {
  func.func @gine_conv_kernel(%arg0: i32, %arg1: memref<32x128xf32, #tpu.memory_space<vmem>>, %arg2: memref<128x128xf32, #tpu.memory_space<vmem>>, %arg3: memref<128x1xi32, #tpu.memory_space<vmem>>, %arg4: memref<1x128xi32, #tpu.memory_space<vmem>>, %arg5: memref<128x128xf32, #tpu.memory_space<vmem>>, %arg6: memref<1x128xf32, #tpu.memory_space<vmem>>, %arg7: memref<128x128xf32, #tpu.memory_space<vmem>>, %arg8: memref<1x128xf32, #tpu.memory_space<vmem>>, %arg9: memref<128x128xf32, #tpu.memory_space<vmem>>, %arg10: memref<1x128xf32, #tpu.memory_space<vmem>>, %arg11: memref<1x1xf32, #tpu.memory_space<smem>>, %arg12: memref<32x128xf32, #tpu.memory_space<vmem>>, %arg13: memref<32x128xf32, #tpu.memory_space<vmem>>) attributes {dimension_semantics = [#tpu.dimension_semantics<arbitrary>], iteration_bounds = array<i64: 1>, scalar_prefetch = 0 : i64, scratch_operands = 1 : i64, tpu.core_type = #tpu.core_type<tc>, window_params = [{pipeline_mode = #tpu.pipeline_mode<synchronous>, transform_indices = @transform_0, window_bounds = array<i64: 32, 128>}, {transform_indices = @transform_1, window_bounds = array<i64: 128, 128>}, {transform_indices = @transform_2, window_bounds = array<i64: 128, 1>}, {transform_indices = @transform_3, window_bounds = array<i64: 1, 128>}, {pipeline_mode = #tpu.pipeline_mode<synchronous>, transform_indices = @transform_4, window_bounds = array<i64: 128, 128>}, {pipeline_mode = #tpu.pipeline_mode<synchronous>, transform_indices = @transform_5, window_bounds = array<i64: 1, 128>}, {pipeline_mode = #tpu.pipeline_mode<synchronous>, transform_indices = @transform_6, window_bounds = array<i64: 128, 128>}, {pipeline_mode = #tpu.pipeline_mode<synchronous>, transform_indices = @transform_7, window_bounds = array<i64: 1, 128>}, {pipeline_mode = #tpu.pipeline_mode<synchronous>, transform_indices = @transform_8, window_bounds = array<i64: 128, 128>}, {pipeline_mode = #tpu.pipeline_mode<synchronous>, transform_indices = @transform_9, window_bounds = array<i64: 1, 128>}, {transform_indices = @transform_10, window_bounds = array<i64: 1, 1>}, {pipeline_mode = #tpu.pipeline_mode<synchronous>, transform_indices = @transform_11, window_bounds = array<i64: 32, 128>}]} {
    %c0_i32 = arith.constant 0 : i32
    %0 = arith.cmpi eq, %arg0, %c0_i32 : i32
    %1 = arith.extui %0 : i1 to i32
    %c0_i32_0 = arith.constant 0 : i32
    %2 = arith.cmpi ne, %1, %c0_i32_0 : i32
    scf.if %2 {
      %cst_21 = arith.constant 0.000000e+00 : f32
      %33 = vector.broadcast %cst_21 : f32 to vector<32x128xf32>
      %c0_22 = arith.constant 0 : index
      %c0_23 = arith.constant 0 : index
      %34 = vector.load %arg13[%c0_22, %c0_23] : memref<32x128xf32, #tpu.memory_space<vmem>>, vector<32x128xf32>
      tpu.vector_store %arg13[%c0_22, %c0_23], %33 {strides = array<i32>} : memref<32x128xf32, #tpu.memory_space<vmem>>, vector<32x128xf32>,
    } else {
    }
    %c0 = arith.constant 0 : index
    %c0_1 = arith.constant 0 : index
    %3 = vector.load %arg1[%c0, %c0_1] : memref<32x128xf32, #tpu.memory_space<vmem>>, vector<32x128xf32>
    %c0_2 = arith.constant 0 : index
    %c0_3 = arith.constant 0 : index
    %4 = vector.load %arg2[%c0_2, %c0_3] : memref<128x128xf32, #tpu.memory_space<vmem>>, vector<128x128xf32>
    %c0_4 = arith.constant 0 : index
    %c0_5 = arith.constant 0 : index
    %5 = vector.load %arg3[%c0_4, %c0_5] : memref<128x1xi32, #tpu.memory_space<vmem>>, vector<128x1xi32>
    %c0_6 = arith.constant 0 : index
    %c0_7 = arith.constant 0 : index
    %6 = vector.load %arg4[%c0_6, %c0_7] : memref<1x128xi32, #tpu.memory_space<vmem>>, vector<1x128xi32>
    %c0_8 = arith.constant 0 : index
    %c0_9 = arith.constant 0 : index
    %7 = vector.load %arg5[%c0_8, %c0_9] : memref<128x128xf32, #tpu.memory_space<vmem>>, vector<128x128xf32>
    %cst = arith.constant dense<0.000000e+00> : vector<128x128xf32>
    %8 = tpu.matmul %4, %7, %cst {dimension_numbers = #tpu.dot_dimension_numbers<[1], [0], [0], [1], [0, 0, 1, 1], [], []>} : vector<128x128xf32>, vector<128x128xf32>, vector<128x128xf32> -> vector<128x128xf32>
    %c0_10 = arith.constant 0 : index
    %c0_11 = arith.constant 0 : index
    %9 = vector.load %arg6[%c0_10, %c0_11] : memref<1x128xf32, #tpu.memory_space<vmem>>, vector<1x128xf32>
    %10 = vector.broadcast %9 : vector<1x128xf32> to vector<128x128xf32>
    %11 = arith.addf %8, %10 : vector<128x128xf32>
    %12 = tpu.iota {dimensions = array<i32: 1>} : vector<128x32xi32>
    %13 = vector.broadcast %5 : vector<128x1xi32> to vector<128x32xi32>
    %14 = arith.cmpi eq, %12, %13 : vector<128x32xi32>
    %15 = arith.extui %14 : vector<128x32xi1> to vector<128x32xi32>
    %16 = arith.sitofp %15 : vector<128x32xi32> to vector<128x32xf32>
    %cst_12 = arith.constant dense<0.000000e+00> : vector<128x128xf32>
    %17 = tpu.matmul %16, %3, %cst_12 {dimension_numbers = #tpu.dot_dimension_numbers<[1], [0], [0], [1], [0, 0, 1, 1], [], []>} : vector<128x32xf32>, vector<32x128xf32>, vector<128x128xf32> -> vector<128x128xf32>
    %18 = arith.addf %17, %11 : vector<128x128xf32>
    %cst_13 = arith.constant 0.000000e+00 : f32
    %19 = vector.broadcast %cst_13 : f32 to vector<128x128xf32>
    %20 = arith.maximumf %18, %19 : vector<128x128xf32>
    %21 = tpu.iota {dimensions = array<i32: 0>} : vector<32x128xi32>
    %22 = vector.broadcast %6 : vector<1x128xi32> to vector<32x128xi32>
    %23 = arith.cmpi eq, %21, %22 : vector<32x128xi32>
    %24 = arith.extui %23 : vector<32x128xi1> to vector<32x128xi32>
    %25 = arith.sitofp %24 : vector<32x128xi32> to vector<32x128xf32>
    %c0_14 = arith.constant 0 : index
    %c0_15 = arith.constant 0 : index
    %26 = vector.load %arg13[%c0_14, %c0_15] : memref<32x128xf32, #tpu.memory_space<vmem>>, vector<32x128xf32>
    %cst_16 = arith.constant dense<0.000000e+00> : vector<32x128xf32>
    %27 = tpu.matmul %25, %20, %cst_16 {dimension_numbers = #tpu.dot_dimension_numbers<[1], [0], [0], [1], [0, 0, 1, 1], [], []>} : vector<32x128xf32>, vector<128x128xf32>, vector<32x128xf32> -> vector<32x128xf32>
    %28 = arith.addf %26, %27 : vector<32x128xf32>
    %c0_17 = arith.constant 0 : index
    %c0_18 = arith.constant 0 : index
    %29 = vector.load %arg13[%c0_17, %c0_18] : memref<32x128xf32, #tpu.memory_space<vmem>>, vector<32x128xf32>
    tpu.vector_store %arg13[%c0_17, %c0_18], %28 {strides = array<i32>} : memref<32x128xf32, #tpu.memory_space<vmem>>, vector<32x128xf32>,
    %c0_i32_19 = arith.constant 0 : i32
    %30 = arith.cmpi eq, %arg0, %c0_i32_19 : i32
    %31 = arith.extui %30 : i1 to i32
    %c0_i32_20 = arith.constant 0 : i32
    %32 = arith.cmpi ne, %31, %c0_i32_20 : i32
    scf.if %32 {
      %c0_21 = arith.constant 0 : index
      %c0_22 = arith.constant 0 : index
      %33 = memref.load %arg11[%c0_21, %c0_22] : memref<1x1xf32, #tpu.memory_space<smem>>
      %c0_23 = arith.constant 0 : index
      %c0_24 = arith.constant 0 : index
      %34 = vector.load %arg13[%c0_23, %c0_24] : memref<32x128xf32, #tpu.memory_space<vmem>>, vector<32x128xf32>
      %cst_25 = arith.constant 1.000000e+00 : f32
      %35 = arith.addf %cst_25, %33 : f32
      %36 = vector.broadcast %35 : f32 to vector<32x128xf32>
      %37 = arith.mulf %36, %3 : vector<32x128xf32>
      %38 = arith.addf %34, %37 : vector<32x128xf32>
      %c0_26 = arith.constant 0 : index
      %c0_27 = arith.constant 0 : index
      %39 = vector.load %arg7[%c0_26, %c0_27] : memref<128x128xf32, #tpu.memory_space<vmem>>, vector<128x128xf32>
      %cst_28 = arith.constant dense<0.000000e+00> : vector<32x128xf32>
      %40 = tpu.matmul %38, %39, %cst_28 {dimension_numbers = #tpu.dot_dimension_numbers<[1], [0], [0], [1], [0, 0, 1, 1], [], []>} : vector<32x128xf32>, vector<128x128xf32>, vector<32x128xf32> -> vector<32x128xf32>
      %c0_29 = arith.constant 0 : index
      %c0_30 = arith.constant 0 : index
      %41 = vector.load %arg8[%c0_29, %c0_30] : memref<1x128xf32, #tpu.memory_space<vmem>>, vector<1x128xf32>
      %42 = vector.broadcast %41 : vector<1x128xf32> to vector<32x128xf32>
      %43 = arith.addf %40, %42 : vector<32x128xf32>
      %cst_31 = arith.constant 0.000000e+00 : f32
      %44 = vector.broadcast %cst_31 : f32 to vector<32x128xf32>
      %45 = arith.maximumf %43, %44 : vector<32x128xf32>
      %c0_32 = arith.constant 0 : index
      %c0_33 = arith.constant 0 : index
      %46 = vector.load %arg9[%c0_32, %c0_33] : memref<128x128xf32, #tpu.memory_space<vmem>>, vector<128x128xf32>
      %cst_34 = arith.constant dense<0.000000e+00> : vector<32x128xf32>
      %47 = tpu.matmul %45, %46, %cst_34 {dimension_numbers = #tpu.dot_dimension_numbers<[1], [0], [0], [1], [0, 0, 1, 1], [], []>} : vector<32x128xf32>, vector<128x128xf32>, vector<32x128xf32> -> vector<32x128xf32>
      %c0_35 = arith.constant 0 : index
      %c0_36 = arith.constant 0 : index
      %48 = vector.load %arg10[%c0_35, %c0_36] : memref<1x128xf32, #tpu.memory_space<vmem>>, vector<1x128xf32>
      %49 = vector.broadcast %48 : vector<1x128xf32> to vector<32x128xf32>
      %50 = arith.addf %47, %49 : vector<32x128xf32>
      %cst_37 = arith.constant 0.000000e+00 : f32
      %51 = vector.broadcast %cst_37 : f32 to vector<32x128xf32>
      %52 = arith.maximumf %50, %51 : vector<32x128xf32>
      %c0_38 = arith.constant 0 : index
      %c0_39 = arith.constant 0 : index
      %53 = vector.load %arg12[%c0_38, %c0_39] : memref<32x128xf32, #tpu.memory_space<vmem>>, vector<32x128xf32>
      tpu.vector_store %arg12[%c0_38, %c0_39], %52 {strides = array<i32>} : memref<32x128xf32, #tpu.memory_space<vmem>>, vector<32x128xf32>,
    } else {
    }
    return
  }
  func.func @transform_0(%arg0: i32) -> (i32, i32) {
    %c0_i32 = arith.constant 0 : i32
    %c0_i32_0 = arith.constant 0 : i32
    %c0_i32_1 = arith.constant 0 : i32
    return %c0_i32, %c0_i32_0 : i32, i32
  }
  func.func @transform_1(%arg0: i32) -> (i32, i32) {
    %c0_i32 = arith.constant 0 : i32
    %c0_i32_0 = arith.constant 0 : i32
    return %arg0, %c0_i32 : i32, i32
  }
  func.func @transform_2(%arg0: i32) -> (i32, i32) {
    %c0_i32 = arith.constant 0 : i32
    %c0_i32_0 = arith.constant 0 : i32
    return %arg0, %c0_i32 : i32, i32
  }
  func.func @transform_3(%arg0: i32) -> (i32, i32) {
    %c0_i32 = arith.constant 0 : i32
    %c0_i32_0 = arith.constant 0 : i32
    return %c0_i32, %arg0 : i32, i32
  }
  func.func @transform_4(%arg0: i32) -> (i32, i32) {
    %c0_i32 = arith.constant 0 : i32
    %c0_i32_0 = arith.constant 0 : i32
    %c0_i32_1 = arith.constant 0 : i32
    return %c0_i32, %c0_i32_0 : i32, i32
  }
  func.func @transform_5(%arg0: i32) -> (i32, i32) {
    %c0_i32 = arith.constant 0 : i32
    %c0_i32_0 = arith.constant 0 : i32
    %c0_i32_1 = arith.constant 0 : i32
    return %c0_i32, %c0_i32_0 : i32, i32
  }
  func.func @transform_6(%arg0: i32) -> (i32, i32) {
    %c0_i32 = arith.constant 0 : i32
    %c0_i32_0 = arith.constant 0 : i32
    %c0_i32_1 = arith.constant 0 : i32
    return %c0_i32, %c0_i32_0 : i32, i32
  }
  func.func @transform_7(%arg0: i32) -> (i32, i32) {
    %c0_i32 = arith.constant 0 : i32
    %c0_i32_0 = arith.constant 0 : i32
    %c0_i32_1 = arith.constant 0 : i32
    return %c0_i32, %c0_i32_0 : i32, i32
  }
  func.func @transform_8(%arg0: i32) -> (i32, i32) {
    %c0_i32 = arith.constant 0 : i32
    %c0_i32_0 = arith.constant 0 : i32
    %c0_i32_1 = arith.constant 0 : i32
    return %c0_i32, %c0_i32_0 : i32, i32
  }
  func.func @transform_9(%arg0: i32) -> (i32, i32) {
    %c0_i32 = arith.constant 0 : i32
    %c0_i32_0 = arith.constant 0 : i32
    %c0_i32_1 = arith.constant 0 : i32
    return %c0_i32, %c0_i32_0 : i32, i32
  }
  func.func @transform_10(%arg0: i32) -> (i32, i32) {
    %c0_i32 = arith.constant 0 : i32
    %c0_i32_0 = arith.constant 0 : i32
    %c0_i32_1 = arith.constant 0 : i32
    return %c0_i32, %c0_i32_0 : i32, i32
  }
  func.func @transform_11(%arg0: i32) -> (i32, i32) {
    %c0_i32 = arith.constant 0 : i32
    %c0_i32_0 = arith.constant 0 : i32
    %c0_i32_1 = arith.constant 0 : i32
    return %c0_i32, %c0_i32_0 : i32, i32
  }
}

</mosaic_0001>

<bundles_post_ra>
// kernel: tpu_custom_call.1
= control target key start
LH: loop header
LB: loop body
LE: loop exit
PB: predicated region body
PF: predicated region fallthrough
CT: control target
= control target key end

     0   :  { %17 = vsyncpa [#allocation5], 0  ;;  %s2032_s0 = inlined_call_operand.hbm [shape: f32[32,128], index: 0, kind: input, shape index: {}]   ;;  %s2033_s1 = inlined_call_operand.vmem [shape: f32[128,128], index: 1, kind: input, shape index: {}]   ;;  %s2034_s2 = inlined_call_operand.vmem [shape: s32[128,1], index: 2, kind: input, shape index: {}]   ;;  %s2035_s3 = inlined_call_operand.vmem [shape: s32[1,128], index: 3, kind: input, shape index: {}]   ;;  %s2036_s4 = inlined_call_operand.hbm [shape: f32[128,128], index: 4, kind: input, shape index: {}]   ;;  %s2037_s5 = inlined_call_operand.vmem [shape: f32[1,128], index: 5, kind: input, shape index: {}]   ;;  %s2038_s6 = inlined_call_operand.hbm [shape: f32[128,128], index: 6, kind: input, shape index: {}]   ;;  %s2039_s7 = inlined_call_operand.vmem [shape: f32[1,128], index: 7, kind: input, shape index: {}]   ;;  %s2040_s8 = inlined_call_operand.hbm [shape: f32[128,128], index: 8, kind: input, shape index: {}]   ;;  %s2041_s9 = inlined_call_operand.vmem [shape: f32[1,128], index: 9, kind: input, shape index: {}]   ;;  %s2042_s10 = inlined_call_operand.<no memory space> [shape: f32[1,1], index: 10, kind: input, shape index: {}]   ;;  %s2043_s11 = inlined_call_operand.hbm [shape: f32[32,128], index: 11, kind: output, shape index: {}]  }
   0x1   :  { %18 = vsyncpa [#allocation8], 0 }
   0x2   :  { %19 = vsyncpa [#allocation11], 0 }
   0x3   :  { %20 = vsyncpa [#allocation6], 0  ;;  %s1655_s17 = smov [#allocation7]   ;;  %s1656_s19 = smov [#allocation4]  }
   0x4   :  { %s44_s18 = sshll.u32 %s1655_s17, 4  ;;  %s26_s20 = sshll.u32 %s1656_s19, 4  ;;  %s45_s18 = int_to_ptr.vmem [resolvable:$true] %s44_s18  ;;  %s1725_s20 = int_to_ptr.vmem [resolvable:$true] %s26_s20 }
   0x5   :  { %s1537_s23 = scalar_lea.hbm %s2036_s4, 2048 }
   0x6   :  { %p1538_p0 = scmp.ne.s32.totalorder %s2036_s4, %s1537_s23  ;;  %p1541_p1 = scmp.lt.u32.totalorder %s1537_s23, %s2036_s4 }
   0x8   :  { %p1543_p2 = pnand %p1541_p1, %p1538_p0 }
   0xa   :  { %1546 = shalt.err (!%p1543_p2)
}
   0xb   :  { %s1547_s28 = scalar_lea.vmem %s45_s18, 2048  ;;  %p1552_p4 = scmp.lt.s32.totalorder %s45_s18, %s45_s18 }
   0xc   :  { %p1548_p3 = scmp.ne.s32.totalorder %s45_s18, %s1547_s28  ;;  %p1553_p5 = scmp.lt.s32.totalorder %s1547_s28, %s1547_s28 }
   0xe   :  { %p1554_p6 = por %p1553_p5, %p1552_p4 }
  0x10   :  { %p1555_p7 = pnand %p1554_p6, %p1548_p3 }
  0x12   :  { %1558 = shalt.err (!%p1555_p7)
}
  0x13   :  { %s1657_s29 = smov 128   ;;  %s1658_s30 = smov 8  }
  0x14   :  { %50 = dma.hbm_to_vmem [thread:$0]  %s2036_s4, 2048, %s45_s18, [#allocation8], %s1657_s29, %s1657_s29, %s1658_s30  }
  0x15   :  { %s1559_s16 = scalar_lea.hbm %s2032_s0, 512 }
  0x16   :  { %p1560_p8 = scmp.ne.s32.totalorder %s2032_s0, %s1559_s16  ;;  %p1563_p9 = scmp.lt.u32.totalorder %s1559_s16, %s2032_s0 }
  0x18   :  { %p1565_p10 = pnand %p1563_p9, %p1560_p8 }
  0x1a   :  { %1568 = shalt.err (!%p1565_p10)
}
  0x1b   :  { %s1569_s23 = scalar_lea.vmem %s1725_s20, 512  ;;  %p1574_p12 = scmp.lt.s32.totalorder %s1725_s20, %s1725_s20 }
  0x1c   :  { %p1570_p11 = scmp.ne.s32.totalorder %s1725_s20, %s1569_s23  ;;  %p1575_p13 = scmp.lt.s32.totalorder %s1569_s23, %s1569_s23 }
  0x1e   :  { %p1576_p0 = por %p1575_p13, %p1574_p12 }
  0x20   :  { %p1577_p1 = pnand %p1576_p0, %p1570_p11 }
  0x22   :  { %1580 = shalt.err (!%p1577_p1)
}
  0x23   :  { %32 = dma.hbm_to_vmem [thread:$0]  %s2032_s0, 512, %s1725_s20, [#allocation5], %s1657_s29, %s1657_s29, %s1658_s30  }
  0x24   :  { %s1659_s24 = smov [#allocation9]   ;;  %s1660_s26 = smov [#allocation10]  }
  0x25   :  { %s58_s25 = sshll.u32 %s1659_s24, 4  ;;  %s72_s27 = sshll.u32 %s1660_s26, 4  ;;  %s59_s25 = int_to_ptr.vmem [resolvable:$true] %s58_s25  ;;  %s1762_s27 = int_to_ptr.vmem [resolvable:$true] %s72_s27 }
  0x26   :  { %s1581_s13 = scalar_lea.hbm %s2038_s6, 2048 }
  0x27   :  { %p1582_p2 = scmp.ne.s32.totalorder %s2038_s6, %s1581_s13  ;;  %p1585_p3 = scmp.lt.u32.totalorder %s1581_s13, %s2038_s6 }
  0x29   :  { %p1587_p4 = pnand %p1585_p3, %p1582_p2 }
  0x2b   :  { %1590 = shalt.err (!%p1587_p4)
}
  0x2c   :  { %s1591_s0 = scalar_lea.vmem %s59_s25, 2048  ;;  %p1596_p6 = scmp.lt.s32.totalorder %s59_s25, %s59_s25 }
  0x2d   :  { %p1592_p5 = scmp.ne.s32.totalorder %s59_s25, %s1591_s0  ;;  %p1597_p7 = scmp.lt.s32.totalorder %s1591_s0, %s1591_s0 }
  0x2f   :  { %p1598_p8 = por %p1597_p7, %p1596_p6 }
  0x31   :  { %p1599_p9 = pnand %p1598_p8, %p1592_p5 }
  0x33   :  { %1602 = shalt.err (!%p1599_p9)
}
  0x34   :  { %64 = dma.hbm_to_vmem [thread:$0]  %s2038_s6, 2048, %s59_s25, [#allocation8], %s1657_s29, %s1657_s29, %s1658_s30  }
  0x35   :  { %s1603_s23 = scalar_lea.hbm %s2040_s8, 2048 }
  0x36   :  { %p1604_p10 = scmp.ne.s32.totalorder %s2040_s8, %s1603_s23  ;;  %p1607_p11 = scmp.lt.u32.totalorder %s1603_s23, %s2040_s8 }
  0x38   :  { %p1609_p12 = pnand %p1607_p11, %p1604_p10 }
  0x3a   :  { %1612 = shalt.err (!%p1609_p12)
}
  0x3b   :  { %s1613_s28 = scalar_lea.vmem %s1762_s27, 2048  ;;  %p1618_p0 = scmp.lt.s32.totalorder %s1762_s27, %s1762_s27 }
  0x3c   :  { %p1614_p13 = scmp.ne.s32.totalorder %s1762_s27, %s1613_s28  ;;  %p1619_p1 = scmp.lt.s32.totalorder %s1613_s28, %s1613_s28 }
  0x3e   :  { %p1620_p2 = por %p1619_p1, %p1618_p0 }
  0x40   :  { %p1621_p3 = pnand %p1620_p2, %p1614_p13 }
  0x42   :  { %1624 = shalt.err (!%p1621_p3)
}
  0x43   :  { %78 = dma.hbm_to_vmem [thread:$0]  %s2040_s8, 2048, %s1762_s27, [#allocation11], %s1657_s29, %s1657_s29, %s1658_s30  }
  0x44   :  { %1647 = dma.done.wait [#allocation5], 512  }
  0x45   :  { %1648 = vsyncadd [#allocation5], 4294966784 }
  0x46   :  { %1649 = dma.done.wait [#allocation8], 4096  }
  0x47   :  { %1650 = vsyncadd [#allocation8], 4294963200 }
  0x48   :  { %1651 = dma.done.wait [#allocation11], 2048  }
  0x49   :  { %1652 = vsyncadd [#allocation11], 4294965248  ;;  %v1661_v0 = vmov 0   ;;  %v125_v1 = vld [vmem:[%s2034_s2 + $0x10] sm:$0xff]  ;;  %v123_v2 = vld [vmem:[%s2034_s2] sm:$0xff]  ;;  %v308_v63 = vlaneseq  ;;  %vm406_vm0 = vcmask 261120  }
  0x4a   :  { %1536 = vset.pattern.permute.xlu1 %v1661_v0  ;;  %1535 = vset.pattern.permute.xlu0 %v1661_v0  ;;  %v126_v3 = vld [vmem:[%s2034_s2 + $0x18] sm:$0xff]  ;;  %v124_v4 = vld [vmem:[%s2034_s2 + $0x8] sm:$0xff]  ;;  %v140_v6 = vld [vmem:[#allocation7] sm:$0xff]  ;;  %s742_s14 = sadd.f32 1.0, %s2042_s10 }
  0x4b   :  { %317 = vperm.xlu1 %1536, %v125_v1   ;;  %311 = vperm.xlu0 %1535, %v123_v2   ;;  %v128_v5 = vld [vmem:[%s2034_s2 + $0x28] sm:$0xff]  ;;  %v127_v8 = vld [vmem:[%s2034_s2 + $0x20] sm:$0xff]  ;;  %v142_v10 = vld [vmem:[#allocation7 + $0x10] sm:$0xff]  ;;  %v1908_v0 = vand.u32 127, %v308_v63 }
  0x4c   :  { %v141_v7 = vld [vmem:[#allocation7 + $0x8] sm:$0xff]  ;;  %v143_v11 = vld [vmem:[#allocation7 + $0x18] sm:$0xff]  ;;  %v144_v13 = vld [vmem:[#allocation7 + $0x20] sm:$0xff] }
  0x4d   :  { %v1357_v9 = vpack.c.bf16 %v141_v7, %v140_v6  ;;  %v1361_v12 = vpack.c.bf16 %v143_v11, %v142_v10  ;;  %v145_v14 = vld [vmem:[#allocation7 + $0x28] sm:$0xff]  ;;  %v130_v15 = vld [vmem:[%s2034_s2 + $0x38] sm:$0xff]  ;;  %v129_v16 = vld [vmem:[%s2034_s2 + $0x30] sm:$0xff] }
  0x4e   :  { %v1823_v17 = vld [vmem:[#allocation4] sm:$0xff]  ;;  %v1825_v18 = vld [vmem:[#allocation4 + $0x8] sm:$0xff]  ;;  %v1365_v19 = vpack.c.bf16 %v145_v14, %v144_v13  ;;  %v1832_v22 = vld [vmem:[#allocation4 + $0x10] sm:$0xff] }
  0x4f   :  { %320 = vperm.xlu1 %1536, %v126_v3   ;;  %314 = vperm.xlu0 %1535, %v124_v4   ;;  %v1389_v20 = vpack.c.bf16 %v1825_v18, %v1823_v17  ;;  %v107_v21 = vld [vmem:[%s2033_s1] sm:$0xff]  ;;  %v146_v23 = vld [vmem:[#allocation7 + $0x30] sm:$0xff]  ;;  %v147_v24 = vld [vmem:[#allocation7 + $0x38] sm:$0xff]  ;;  %v1662_v3 = vmov 0.0  }
  0x50   :  { %1358 = vmatprep.subr.bf16.mxu0 %v1357_v9  ;;  %1187 = vmatprep.mubr.f32.mxu0 %v107_v21  ;;  %v1834_v25 = vld [vmem:[#allocation4 + $0x18] sm:$0xff]  ;;  %v132_v27 = vld [vmem:[%s2034_s2 + $0x48] sm:$0xff]  ;;  %v131_v28 = vld [vmem:[%s2034_s2 + $0x40] sm:$0xff]  ;;  %v1369_v29 = vpack.c.bf16 %v147_v24, %v146_v23 }
  0x51   :  { %1360 = vmatpush3.bf16.msra.mxu0 %v1357_v9  ;;  %v1393_v26 = vpack.c.bf16 %v1834_v25, %v1832_v22  ;;  %1390 = vmatprep.subr.bf16.mxu1 %v1389_v20  ;;  %v148_v30 = vld [vmem:[#allocation7 + $0x40] sm:$0xff]  ;;  %v149_v31 = vld [vmem:[#allocation7 + $0x48] sm:$0xff]  ;;  %v134_v32 = vld [vmem:[%s2034_s2 + $0x58] sm:$0xff] }
  0x52   :  { %1362 = vmatprep.subr.bf16.mxu0 %v1361_v12  ;;  %1392 = vmatpush3.bf16.msra.mxu1 %v1389_v20  ;;  %v133_v33 = vld [vmem:[%s2034_s2 + $0x50] sm:$0xff]  ;;  %v1373_v34 = vpack.c.bf16 %v149_v31, %v148_v30  ;;  %v151_v36 = vld [vmem:[#allocation7 + $0x58] sm:$0xff]  ;;  %v136_v37 = vld [vmem:[%s2034_s2 + $0x68] sm:$0xff] }
  0x53   :  { %326 = vperm.xlu1 %1536, %v128_v5   ;;  %323 = vperm.xlu0 %1535, %v127_v8   ;;  %v150_v35 = vld [vmem:[#allocation7 + $0x50] sm:$0xff]  ;;  %v135_v38 = vld [vmem:[%s2034_s2 + $0x60] sm:$0xff]  ;;  %v153_v41 = vld [vmem:[#allocation7 + $0x68] sm:$0xff] }
  0x54   :  { %1394 = vmatprep.subr.bf16.mxu1 %v1393_v26  ;;  %v1377_v39 = vpack.c.bf16 %v151_v36, %v150_v35  ;;  %v152_v40 = vld [vmem:[#allocation7 + $0x60] sm:$0xff]  ;;  %v138_v42 = vld [vmem:[%s2034_s2 + $0x78] sm:$0xff]  ;;  %v137_v43 = vld [vmem:[%s2034_s2 + $0x70] sm:$0xff] }
  0x55   :  { %1364 = vmatpush3.bf16.msra.mxu0 %v1361_v12  ;;  %v1381_v44 = vpack.c.bf16 %v153_v41, %v152_v40  ;;  %v154_v45 = vld [vmem:[#allocation7 + $0x70] sm:$0xff]  ;;  %v155_v46 = vld [vmem:[#allocation7 + $0x78] sm:$0xff]  ;;  %v108_v48 = vld [vmem:[%s2033_s1 + $0x8] sm:$0xff]  ;;  %v617_v40 = vshrl.u32 %v308_v63, 7 }
  0x56   :  { %1366 = vmatprep.subr.bf16.mxu0 %v1365_v19  ;;  %1396 = vmatpush3.bf16.msra.mxu1 %v1393_v26  ;;  %v1385_v47 = vpack.c.bf16 %v155_v46, %v154_v45  ;;  %v109_v49 = vld [vmem:[%s2033_s1 + $0x10] sm:$0xff]  ;;  %v110_v50 = vld [vmem:[%s2033_s1 + $0x18] sm:$0xff]  ;;  %v111_v51 = vld [vmem:[%s2033_s1 + $0x20] sm:$0xff]  ;;  %v1663_v45 = vmov 1.0  }
  0x57   :  { %332 = vperm.xlu1 %1536, %v130_v15   ;;  %329 = vperm.xlu0 %1535, %v129_v16   ;;  %v112_v52 = vld [vmem:[%s2033_s1 + $0x28] sm:$0xff]  ;;  %v113_v53 = vld [vmem:[%s2033_s1 + $0x30] sm:$0xff]  ;;  %v114_v54 = vld [vmem:[%s2033_s1 + $0x38] sm:$0xff]  ;;  %v1954_v46 = vadd.s32 16, %v617_v40 }
  0x58   :  { %v115_v55 = vld [vmem:[%s2033_s1 + $0x40] sm:$0xff]  ;;  %v116_v56 = vld [vmem:[%s2033_s1 + $0x48] sm:$0xff]  ;;  %v117_v57 = vld [vmem:[%s2033_s1 + $0x50] sm:$0xff] }
  0x59   :  { %1368 = vmatpush3.bf16.msra.mxu0 %v1365_v19  ;;  %v118_v58 = vld [vmem:[%s2033_s1 + $0x58] sm:$0xff]  ;;  %v119_v59 = vld [vmem:[%s2033_s1 + $0x60] sm:$0xff]  ;;  %v120_v60 = vld [vmem:[%s2033_s1 + $0x68] sm:$0xff] }
  0x5a   :  { %1370 = vmatprep.subr.bf16.mxu0 %v1369_v29  ;;  %v121_v61 = vld [vmem:[%s2033_s1 + $0x70] sm:$0xff]  ;;  %v122_v62 = vld [vmem:[%s2033_s1 + $0x78] sm:$0xff]  ;;  %v1946_v41 = vld [vmem:[%s2035_s3] ss:$0 sm:$0xff] }
  0x5b   :  { %338 = vperm.xlu1 %1536, %v132_v27   ;;  %335 = vperm.xlu0 %1535, %v131_v28  }
  0x5d   :  { %1372 = vmatpush3.bf16.msra.mxu0 %v1369_v29 }
  0x5e   :  { %1374 = vmatprep.subr.bf16.mxu0 %v1373_v34 }
  0x5f   :  { %344 = vperm.xlu1 %1536, %v134_v32   ;;  %341 = vperm.xlu0 %1535, %v133_v33  }
  0x61   :  { %1376 = vmatpush3.bf16.msra.mxu0 %v1373_v34 }
  0x62   :  { %1378 = vmatprep.subr.bf16.mxu0 %v1377_v39 }
  0x63   :  { %350 = vperm.xlu1 %1536, %v136_v37   ;;  %347 = vperm.xlu0 %1535, %v135_v38  }
  0x65   :  { %1380 = vmatpush3.bf16.msra.mxu0 %v1377_v39 }
  0x66   :  { %1382 = vmatprep.subr.bf16.mxu0 %v1381_v44 }
  0x67   :  { %356 = vperm.xlu1 %1536, %v138_v42   ;;  %353 = vperm.xlu0 %1535, %v137_v43   ;;  %v1948_v42 = vadd.s32 8, %v617_v40 }
  0x69   :  { %1384 = vmatpush3.bf16.msra.mxu0 %v1381_v44 }
  0x6a   :  { %1386 = vmatprep.subr.bf16.mxu0 %v1385_v47 }
  0x6d   :  { %1388 = vmatpush3.bf16.msra.mxu0 %v1385_v47  ;;  %v1956_v47 = vadd.s32 24, %v617_v40 }
  0x70   :  { %1188 = vmatmul.mubr.f32.vlgmr.msra.gmra.mrb[0].mxu0 %v108_v48 }
  0x71   :  { %1190 = vmatprep.mubr.f32.mxu0 %v109_v49 }
  0x74   :  { %1191 = vmatmul.mubr.f32.gmra.mrb[2].mxu0 %v110_v50 }
  0x75   :  { %1193 = vmatprep.mubr.f32.mxu0 %v111_v51 }
  0x78   :  { %1194 = vmatmul.mubr.f32.gmra.mrb[4].mxu0 %v112_v52 }
  0x79   :  { %1196 = vmatprep.mubr.f32.mxu0 %v113_v53 }
  0x7c   :  { %1197 = vmatmul.mubr.f32.gmra.mrb[6].mxu0 %v114_v54 }
  0x7d   :  { %1199 = vmatprep.mubr.f32.mxu0 %v115_v55 }
  0x80   :  { %1200 = vmatmul.mubr.f32.gmra.mrb[8].mxu0 %v116_v56 }
  0x81   :  { %1202 = vmatprep.mubr.f32.mxu0 %v117_v57 }
  0x84   :  { %1203 = vmatmul.mubr.f32.gmra.mrb[10].mxu0 %v118_v58 }
  0x85   :  { %1205 = vmatprep.mubr.f32.mxu0 %v119_v59 }
  0x88   :  { %1206 = vmatmul.mubr.f32.gmra.mrb[12].mxu0 %v120_v60  ;;  %v1971_v60 = vld [vmem:[%s2037_s5] ss:$0 sm:$0xff] }
  0x89   :  { %1208 = vmatprep.mubr.f32.mxu0 %v121_v61 }
  0x8c   :  { %1209 = vmatmul.mubr.f32.gmra.mrb[14].mxu0 %v122_v62 }
  0xca   :  { %v318_v1 = vpop.permute.xlu1 %317  ;;  %v312_v2 = vpop.permute.xlu0 %311 }
  0xcb   :  { %vm358_vm1 = vcmp.eq.s32.totalorder %v1908_v0, %v312_v2  ;;  %vm360_vm2 = vcmp.eq.s32.totalorder %v1908_v0, %v318_v1 }
  0xcc   :  { %v1000_v4 = vsel %vm358_vm1, 1.0, %v1662_v3  ;;  %v1002_v7 = vsel %vm360_vm2, 1.0, %v1662_v3  ;;  %vm625_vm2 = vcmp.eq.s32.totalorder %v617_v40, %v1946_v41 }
  0xcd   :  { %1219 = vmatprep.mubr.msk.f32.mxu1 %vm406_vm0, %v1000_v4 }
  0xce   :  { %v321_v5 = vpop.permute.xlu1 %320  ;;  %v315_v6 = vpop.permute.xlu0 %314 }
  0xcf   :  { %vm359_vm3 = vcmp.eq.s32.totalorder %v1908_v0, %v315_v6  ;;  %vm361_vm4 = vcmp.eq.s32.totalorder %v1908_v0, %v321_v5 }
  0xd0   :  { %v1001_v8 = vsel %vm359_vm3, 1.0, %v1662_v3  ;;  %v1003_v11 = vsel %vm361_vm4, 1.0, %v1662_v3  ;;  %vm627_vm3 = vcmp.eq.s32.totalorder %v1954_v46, %v1946_v41  ;;  %vm628_vm4 = vcmp.eq.s32.totalorder %v1956_v47, %v1946_v41  ;;  %v762_v46 = vld [vmem:[#allocation9 + $0x50] sm:$0xff] }
  0xd1   :  { %1220 = vmatmul.mubr.msk.f32.vlgmr.msra.gmra.mrb[0].mxu1 %vm406_vm0, %v1001_v8 }
  0xd2   :  { %v327_v9 = vpop.permute.xlu1 %326  ;;  %v324_v10 = vpop.permute.xlu0 %323  ;;  %1222 = vmatprep.mubr.msk.f32.mxu1 %vm406_vm0, %v1002_v7 }
  0xd3   :  { %vm362_vm5 = vcmp.eq.s32.totalorder %v1908_v0, %v324_v10  ;;  %vm363_vm6 = vcmp.eq.s32.totalorder %v1908_v0, %v327_v9 }
  0xd4   :  { %v1004_v12 = vsel %vm362_vm5, 1.0, %v1662_v3  ;;  %v1005_v15 = vsel %vm363_vm6, 1.0, %v1662_v3 }
  0xd5   :  { %1223 = vmatmul.mubr.msk.f32.gmra.mrb[2].mxu1 %vm406_vm0, %v1003_v11 }
  0xd6   :  { %v333_v13 = vpop.permute.xlu1 %332  ;;  %v330_v14 = vpop.permute.xlu0 %329  ;;  %1225 = vmatprep.mubr.msk.f32.mxu1 %vm406_vm0, %v1004_v12 }
  0xd7   :  { %vm364_vm7 = vcmp.eq.s32.totalorder %v1908_v0, %v330_v14  ;;  %vm365_vm8 = vcmp.eq.s32.totalorder %v1908_v0, %v333_v13 }
  0xd8   :  { %v1006_v16 = vsel %vm364_vm7, 1.0, %v1662_v3  ;;  %v1007_v21 = vsel %vm365_vm8, 1.0, %v1662_v3 }
  0xd9   :  { %1226 = vmatmul.mubr.msk.f32.gmra.mrb[4].mxu1 %vm406_vm0, %v1005_v15 }
  0xda   :  { %v339_v19 = vpop.permute.xlu1 %338  ;;  %v336_v20 = vpop.permute.xlu0 %335  ;;  %1228 = vmatprep.mubr.msk.f32.mxu1 %vm406_vm0, %v1006_v16 }
  0xdb   :  { %vm366_vm9 = vcmp.eq.s32.totalorder %v1908_v0, %v336_v20  ;;  %vm367_vm10 = vcmp.eq.s32.totalorder %v1908_v0, %v339_v19 }
  0xdc   :  { %v1008_v23 = vsel %vm366_vm9, 1.0, %v1662_v3  ;;  %v1009_v27 = vsel %vm367_vm10, 1.0, %v1662_v3 }
  0xdd   :  { %1229 = vmatmul.mubr.msk.f32.gmra.mrb[6].mxu1 %vm406_vm0, %v1007_v21 }
  0xde   :  { %v345_v24 = vpop.permute.xlu1 %344  ;;  %v342_v26 = vpop.permute.xlu0 %341  ;;  %1231 = vmatprep.mubr.msk.f32.mxu1 %vm406_vm0, %v1008_v23 }
  0xdf   :  { %vm368_vm11 = vcmp.eq.s32.totalorder %v1908_v0, %v342_v26  ;;  %vm369_vm12 = vcmp.eq.s32.totalorder %v1908_v0, %v345_v24 }
  0xe0   :  { %v1010_v28 = vsel %vm368_vm11, 1.0, %v1662_v3  ;;  %v1011_v31 = vsel %vm369_vm12, 1.0, %v1662_v3 }
  0xe1   :  { %1232 = vmatmul.mubr.msk.f32.gmra.mrb[8].mxu1 %vm406_vm0, %v1009_v27 }
  0xe2   :  { %v351_v29 = vpop.permute.xlu1 %350  ;;  %v348_v30 = vpop.permute.xlu0 %347  ;;  %1234 = vmatprep.mubr.msk.f32.mxu1 %vm406_vm0, %v1010_v28 }
  0xe3   :  { %vm370_vm13 = vcmp.eq.s32.totalorder %v1908_v0, %v348_v30  ;;  %vm371_vm14 = vcmp.eq.s32.totalorder %v1908_v0, %v351_v29 }
  0xe4   :  { %v1012_v32 = vsel %vm370_vm13, 1.0, %v1662_v3  ;;  %v1013_v35 = vsel %vm371_vm14, 1.0, %v1662_v3 }
  0xe5   :  { %1235 = vmatmul.mubr.msk.f32.gmra.mrb[10].mxu1 %vm406_vm0, %v1011_v31 }
  0xe6   :  { %v357_v33 = vpop.permute.xlu1 %356  ;;  %v354_v34 = vpop.permute.xlu0 %353  ;;  %1237 = vmatprep.mubr.msk.f32.mxu1 %vm406_vm0, %v1012_v32 }
  0xe7   :  { %vm372_vm15 = vcmp.eq.s32.totalorder %v1908_v0, %v354_v34  ;;  %vm373_vm1 = vcmp.eq.s32.totalorder %v1908_v0, %v357_v33 }
  0xe8   :  { %v1014_v36 = vsel %vm372_vm15, 1.0, %v1662_v3  ;;  %v1015_v37 = vsel %vm373_vm1, 1.0, %v1662_v3 }
  0xe9   :  { %1238 = vmatmul.mubr.msk.f32.gmra.mrb[12].mxu1 %vm406_vm0, %v1013_v35 }
  0xea   :  { %1240 = vmatprep.mubr.msk.f32.mxu1 %vm406_vm0, %v1014_v36 }
  0xed   :  { %1241 = vmatmul.mubr.msk.f32.gmra.mrb[14].mxu1 %vm406_vm0, %v1015_v37  ;;  %vm626_vm0 = vcmp.eq.s32.totalorder %v1948_v42, %v1946_v41  ;;  %v760_v42 = vld [vmem:[#allocation9 + $0x40] sm:$0xff]  ;;  %v766_v41 = vld [vmem:[#allocation9 + $0x70] sm:$0xff] }
  0xee   :  { %1275 = vmatprep.mubr.msk.f32.mxu1 %vm625_vm2, %v1663_v45 }
 0x143   :  { %v1189_v38 = vpop.f32.mrb[0].mxu0 }
 0x144   :  { %v229_v39 = vpop.f32.mrb[1].mxu0  ;;  %v235_v61 = vadd.f32 %v1189_v38, %v1971_v60 }
 0x145   :  { %v230_v62 = vadd.f32 %v1971_v60, %v229_v39 }
 0x147   :  { %v1192_v43 = vpop.f32.mrb[2].mxu0 }
 0x148   :  { %v239_v44 = vpop.f32.mrb[3].mxu0  ;;  %v245_v1 = vadd.f32 %v1192_v43, %v1971_v60 }
 0x149   :  { %v240_v4 = vadd.f32 %v1971_v60, %v239_v44 }
 0x14b   :  { %v1195_v48 = vpop.f32.mrb[4].mxu0 }
 0x14c   :  { %v249_v49 = vpop.f32.mrb[5].mxu0  ;;  %v255_v9 = vadd.f32 %v1195_v48, %v1971_v60 }
 0x14d   :  { %v250_v13 = vadd.f32 %v1971_v60, %v249_v49 }
 0x14f   :  { %v1198_v50 = vpop.f32.mrb[6].mxu0 }
 0x150   :  { %v259_v51 = vpop.f32.mrb[7].mxu0  ;;  %v265_v20 = vadd.f32 %v1198_v50, %v1971_v60 }
 0x151   :  { %v260_v26 = vadd.f32 %v1971_v60, %v259_v51 }
 0x153   :  { %v1201_v52 = vpop.f32.mrb[8].mxu0 }
 0x154   :  { %v269_v53 = vpop.f32.mrb[9].mxu0  ;;  %v275_v31 = vadd.f32 %v1201_v52, %v1971_v60 }
 0x155   :  { %v270_v35 = vadd.f32 %v1971_v60, %v269_v53 }
 0x157   :  { %v1204_v54 = vpop.f32.mrb[10].mxu0 }
 0x158   :  { %v279_v55 = vpop.f32.mrb[11].mxu0  ;;  %v285_v40 = vadd.f32 %v1204_v54, %v1971_v60 }
 0x159   :  { %v280_v49 = vadd.f32 %v1971_v60, %v279_v55 }
 0x15b   :  { %v1207_v56 = vpop.f32.mrb[12].mxu0 }
 0x15c   :  { %v1962_v57 = vpop.f32.mrb[13].mxu0  ;;  %v295_v53 = vadd.f32 %v1207_v56, %v1971_v60 }
 0x15d   :  { %v290_v54 = vadd.f32 %v1971_v60, %v1962_v57 }
 0x15f   :  { %v1964_v58 = vpop.f32.mrb[14].mxu0 }
 0x160   :  { %v1966_v59 = vpop.f32.mrb[15].mxu0  ;;  %v305_v55 = vadd.f32 %v1964_v58, %v1971_v60 }
 0x161   :  { %v300_v56 = vadd.f32 %v1971_v60, %v1966_v59  ;;  %v756_v60 = vld [vmem:[#allocation9 + $0x20] sm:$0xff] }
 0x1a4   :  { %v1221_v63 = vpop.f32.mrb[0].mxu1 }
 0x1a5   :  { %v527_v0 = vadd.f32 %v1221_v63, %v235_v61  ;;  %v521_v2 = vpop.f32.mrb[1].mxu1 }
 0x1a6   :  { %v522_v3 = vadd.f32 %v521_v2, %v230_v62 }
 0x1a7   :  { %v601_v5 = vmax.f32 %v527_v0, 0.0 }
 0x1a8   :  { %v600_v6 = vmax.f32 %v522_v3, 0.0  ;;  %v1224_v7 = vpop.f32.mrb[2].mxu1 }
 0x1a9   :  { %v537_v8 = vadd.f32 %v1224_v7, %v245_v1  ;;  %v531_v10 = vpop.f32.mrb[3].mxu1 }
 0x1aa   :  { %v1397_v11 = vpack.c.bf16 %v601_v5, %v600_v6  ;;  %v532_v12 = vadd.f32 %v531_v10, %v240_v4 }
 0x1ab   :  { %v603_v14 = vmax.f32 %v537_v8, 0.0 }
 0x1ac   :  { %v602_v15 = vmax.f32 %v532_v12, 0.0  ;;  %v1227_v16 = vpop.f32.mrb[4].mxu1  ;;  %1398 = vmatprep.subr.bf16.mxu1 %v1397_v11 }
 0x1ad   :  { %v547_v19 = vadd.f32 %v1227_v16, %v255_v9  ;;  %v541_v21 = vpop.f32.mrb[5].mxu1  ;;  %1400 = vmatpush3.bf16.msra.mxu1 %v1397_v11  ;;  %v753_v16 = vld [vmem:[#allocation9 + $0x8] sm:$0xff] }
 0x1ae   :  { %v1401_v23 = vpack.c.bf16 %v603_v14, %v602_v15  ;;  %v542_v24 = vadd.f32 %v541_v21, %v250_v13  ;;  %v752_v15 = vld [vmem:[#allocation9] sm:$0xff]  ;;  %v754_v21 = vld [vmem:[#allocation9 + $0x10] sm:$0xff] }
 0x1af   :  { %v605_v27 = vmax.f32 %v547_v19, 0.0 }
 0x1b0   :  { %v604_v28 = vmax.f32 %v542_v24, 0.0  ;;  %v1230_v29 = vpop.f32.mrb[6].mxu1  ;;  %1402 = vmatprep.subr.bf16.mxu1 %v1401_v23  ;;  %v757_v24 = vld [vmem:[#allocation9 + $0x28] sm:$0xff] }
 0x1b1   :  { %v557_v30 = vadd.f32 %v1230_v29, %v265_v20  ;;  %v551_v32 = vpop.f32.mrb[7].mxu1  ;;  %1404 = vmatpush3.bf16.msra.mxu1 %v1401_v23  ;;  %v1429_v20 = vpack.c.bf16 %v753_v16, %v752_v15  ;;  %v755_v23 = vld [vmem:[#allocation9 + $0x18] sm:$0xff]  ;;  %v878_v15 = vld [vmem:[#allocation10 + $0x70] sm:$0xff] }
 0x1b2   :  { %v1405_v33 = vpack.c.bf16 %v605_v27, %v604_v28  ;;  %v552_v34 = vadd.f32 %v551_v32, %v260_v26  ;;  %v1433_v59 = vpack.c.bf16 %v755_v23, %v754_v21  ;;  %v1437_v26 = vpack.c.bf16 %v757_v24, %v756_v60  ;;  %v758_v27 = vld [vmem:[#allocation9 + $0x30] sm:$0xff]  ;;  %v759_v28 = vld [vmem:[#allocation9 + $0x38] sm:$0xff] }
 0x1b3   :  { %v607_v36 = vmax.f32 %v557_v30, 0.0  ;;  %v1441_v29 = vpack.c.bf16 %v759_v28, %v758_v27  ;;  %v761_v30 = vld [vmem:[#allocation9 + $0x48] sm:$0xff]  ;;  %v763_v32 = vld [vmem:[#allocation9 + $0x58] sm:$0xff]  ;;  %v1042_v28 = vld [vmem:[%s2041_s9] ss:$0 sm:$0xff] }
 0x1b4   :  { %v606_v37 = vmax.f32 %v552_v34, 0.0  ;;  %v1233_v38 = vpop.f32.mrb[8].mxu1  ;;  %1406 = vmatprep.subr.bf16.mxu1 %v1405_v33  ;;  %v764_v34 = vld [vmem:[#allocation9 + $0x60] sm:$0xff] }
 0x1b5   :  { %v567_v39 = vadd.f32 %v1233_v38, %v275_v31  ;;  %v561_v43 = vpop.f32.mrb[9].mxu1  ;;  %1408 = vmatpush3.bf16.msra.mxu1 %v1405_v33  ;;  %v1445_v31 = vpack.c.bf16 %v761_v30, %v760_v42  ;;  %v1449_v33 = vpack.c.bf16 %v763_v32, %v762_v46  ;;  %v865_v38 = vld [vmem:[#allocation10 + $0x8] sm:$0xff] }
 0x1b6   :  { %v1409_v44 = vpack.c.bf16 %v607_v36, %v606_v37  ;;  %v562_v48 = vadd.f32 %v561_v43, %v270_v35  ;;  %v765_v35 = vld [vmem:[#allocation9 + $0x68] sm:$0xff]  ;;  %v864_v37 = vld [vmem:[#allocation10] sm:$0xff]  ;;  %v867_v43 = vld [vmem:[#allocation10 + $0x18] sm:$0xff] }
 0x1b7   :  { %v609_v50 = vmax.f32 %v567_v39, 0.0  ;;  %v1453_v36 = vpack.c.bf16 %v765_v35, %v764_v34  ;;  %v866_v39 = vld [vmem:[#allocation10 + $0x10] sm:$0xff] }
 0x1b8   :  { %v608_v51 = vmax.f32 %v562_v48, 0.0  ;;  %v1236_v52 = vpop.f32.mrb[10].mxu1  ;;  %1410 = vmatprep.subr.bf16.mxu1 %v1409_v44  ;;  %v868_v48 = vld [vmem:[#allocation10 + $0x20] sm:$0xff] }
 0x1b9   :  { %v577_v61 = vadd.f32 %v1236_v52, %v285_v40  ;;  %v571_v62 = vpop.f32.mrb[11].mxu1  ;;  %1412 = vmatpush3.bf16.msra.mxu1 %v1409_v44  ;;  %v1461_v40 = vpack.c.bf16 %v865_v38, %v864_v37  ;;  %v1465_v44 = vpack.c.bf16 %v867_v43, %v866_v39  ;;  %v871_v52 = vld [vmem:[#allocation10 + $0x38] sm:$0xff] }
 0x1ba   :  { %v1413_v63 = vpack.c.bf16 %v609_v50, %v608_v51  ;;  %v572_v0 = vadd.f32 %v571_v62, %v280_v49  ;;  %v869_v49 = vld [vmem:[#allocation10 + $0x28] sm:$0xff]  ;;  %v870_v51 = vld [vmem:[#allocation10 + $0x30] sm:$0xff] }
 0x1bb   :  { %v611_v1 = vmax.f32 %v577_v61, 0.0  ;;  %1462 = vmatprep.subr.bf16.mxu0 %v1461_v40  ;;  %v1469_v50 = vpack.c.bf16 %v869_v49, %v868_v48  ;;  %v1473_v61 = vpack.c.bf16 %v871_v52, %v870_v51  ;;  %v873_v62 = vld [vmem:[#allocation10 + $0x48] sm:$0xff] }
 0x1bc   :  { %v610_v2 = vmax.f32 %v572_v0, 0.0  ;;  %v1239_v3 = vpop.f32.mrb[12].mxu1  ;;  %1414 = vmatprep.subr.bf16.mxu1 %v1413_v63  ;;  %1464 = vmatpush3.bf16.msra.mxu0 %v1461_v40  ;;  %v874_v0 = vld [vmem:[#allocation10 + $0x50] sm:$0xff] }
 0x1bd   :  { %v587_v4 = vadd.f32 %v1239_v3, %v295_v53  ;;  %v581_v5 = vpop.f32.mrb[13].mxu1  ;;  %1416 = vmatpush3.bf16.msra.mxu1 %v1413_v63  ;;  %1466 = vmatprep.subr.bf16.mxu0 %v1465_v44  ;;  %v872_v53 = vld [vmem:[#allocation10 + $0x40] sm:$0xff]  ;;  %v877_v3 = vld [vmem:[#allocation10 + $0x68] sm:$0xff] }
 0x1be   :  { %v1417_v6 = vpack.c.bf16 %v611_v1, %v610_v2  ;;  %v582_v7 = vadd.f32 %v581_v5, %v290_v54  ;;  %v1477_v63 = vpack.c.bf16 %v873_v62, %v872_v53  ;;  %v875_v54 = vld [vmem:[#allocation10 + $0x58] sm:$0xff]  ;;  %v876_v2 = vld [vmem:[#allocation10 + $0x60] sm:$0xff] }
 0x1bf   :  { %v613_v8 = vmax.f32 %v587_v4, 0.0  ;;  %v1481_v1 = vpack.c.bf16 %v875_v54, %v874_v0  ;;  %v1485_v4 = vpack.c.bf16 %v877_v3, %v876_v2 }
 0x1c0   :  { %v612_v9 = vmax.f32 %v582_v7, 0.0  ;;  %v1242_v10 = vpop.f32.mrb[14].mxu1  ;;  %1418 = vmatprep.subr.bf16.mxu1 %v1417_v6  ;;  %1468 = vmatpush3.bf16.msra.mxu0 %v1465_v44 }
 0x1c1   :  { %v597_v57 = vadd.f32 %v1242_v10, %v305_v55  ;;  %v591_v11 = vpop.f32.mrb[15].mxu1  ;;  %1420 = vmatpush3.bf16.msra.mxu1 %v1417_v6  ;;  %1470 = vmatprep.subr.bf16.mxu0 %v1469_v50  ;;  %v743_v55 = vstv %s742_s14 }
 0x1c2   :  { %v1421_v12 = vpack.c.bf16 %v613_v8, %v612_v9  ;;  %v592_v13 = vadd.f32 %v591_v11, %v300_v56  ;;  %v744_v5 = vmul.f32 %v743_v55, %v1823_v17  ;;  %v745_v6 = vmul.f32 %v743_v55, %v1825_v18  ;;  %v879_v17 = vld [vmem:[#allocation10 + $0x78] sm:$0xff]  ;;  %v1041_v18 = vld [vmem:[%s2039_s7] ss:$0 sm:$0xff]  ;;  %s1664_s7 = smov [#allocation12]  }
 0x1c3   :  { %v615_v14 = vmax.f32 %v597_v57, 0.0  ;;  %v746_v9 = vmul.f32 %v743_v55, %v1832_v22  ;;  %v747_v57 = vmul.f32 %v743_v55, %v1834_v25  ;;  %v1489_v16 = vpack.c.bf16 %v879_v17, %v878_v15  ;;  %s985_s16 = sshll.u32 %s1664_s7, 4  ;;  %s986_s16 = int_to_ptr.vmem [resolvable:$true] %s985_s16 }
 0x1c4   :  { %v614_v58 = vmax.f32 %v592_v13, 0.0  ;;  %1422 = vmatprep.subr.bf16.mxu1 %v1421_v12  ;;  %1472 = vmatpush3.bf16.msra.mxu0 %v1469_v50  ;;  %s1625_s9 = scalar_lea.vmem %s986_s16, 512  ;;  %p1630_p5 = scmp.lt.s32.totalorder %s986_s16, %s986_s16 }
 0x1c5   :  { %1424 = vmatpush3.bf16.msra.mxu1 %v1421_v12  ;;  %1474 = vmatprep.subr.bf16.mxu0 %v1473_v61  ;;  %p1626_p4 = scmp.ne.s32.totalorder %s986_s16, %s1625_s9  ;;  %p1631_p6 = scmp.lt.s32.totalorder %s1625_s9, %s1625_s9 }
 0x1c6   :  { %v1425_v19 = vpack.c.bf16 %v615_v14, %v614_v58 }
 0x1c7   :  { %p1632_p7 = por %p1631_p6, %p1630_p5 }
 0x1c8   :  { %1426 = vmatprep.subr.bf16.mxu1 %v1425_v19  ;;  %1476 = vmatpush3.bf16.msra.mxu0 %v1473_v61 }
 0x1c9   :  { %1428 = vmatpush3.bf16.msra.mxu1 %v1425_v19  ;;  %1478 = vmatprep.subr.bf16.mxu0 %v1477_v63  ;;  %p1633_p8 = pnand %p1632_p7, %p1626_p4 }
 0x1ca   :  { %1430 = vmatprep.subr.bf16.mxu1 %v1429_v20 }
 0x1cc   :  { %1276 = vmatmul.mubr.msk.f32.vlgmr.msra.gmra.mrb[16].mxu1 %vm626_vm0, %v1663_v45  ;;  %1480 = vmatpush3.bf16.msra.mxu0 %v1477_v63 }
 0x1cd   :  { %1278 = vmatprep.mubr.msk.f32.mxu1 %vm627_vm3, %v1663_v45  ;;  %1432 = vmatpush3.bf16.msra.mxu1 %v1429_v20 }
 0x1ce   :  { %1434 = vmatprep.subr.bf16.mxu1 %v1433_v59  ;;  %1482 = vmatprep.subr.bf16.mxu0 %v1481_v1 }
 0x1d0   :  { %1279 = vmatmul.mubr.msk.f32.gmra.mrb[18].mxu1 %vm628_vm4, %v1663_v45  ;;  %v767_v45 = vld [vmem:[#allocation9 + $0x78] sm:$0xff]  ;;  %1484 = vmatpush3.bf16.msra.mxu0 %v1481_v1 }
 0x1d1   :  { %1436 = vmatpush3.bf16.msra.mxu1 %v1433_v59  ;;  %v1457_v47 = vpack.c.bf16 %v767_v45, %v766_v41  ;;  %1486 = vmatprep.subr.bf16.mxu0 %v1485_v4 }
 0x1d2   :  { %1438 = vmatprep.subr.bf16.mxu1 %v1437_v26 }
 0x1d4   :  { %1488 = vmatpush3.bf16.msra.mxu0 %v1485_v4 }
 0x1d5   :  { %1440 = vmatpush3.bf16.msra.mxu1 %v1437_v26  ;;  %1490 = vmatprep.subr.bf16.mxu0 %v1489_v16 }
 0x1d6   :  { %1442 = vmatprep.subr.bf16.mxu1 %v1441_v29 }
 0x1d8   :  { %1492 = vmatpush3.bf16.msra.mxu0 %v1489_v16 }
 0x1d9   :  { %1444 = vmatpush3.bf16.msra.mxu1 %v1441_v29 }
 0x1da   :  { %1446 = vmatprep.subr.bf16.mxu1 %v1445_v31 }
 0x1dd   :  { %1448 = vmatpush3.bf16.msra.mxu1 %v1445_v31 }
 0x1de   :  { %1450 = vmatprep.subr.bf16.mxu1 %v1449_v33 }
 0x1e1   :  { %1452 = vmatpush3.bf16.msra.mxu1 %v1449_v33 }
 0x1e2   :  { %1454 = vmatprep.subr.bf16.mxu1 %v1453_v36 }
 0x1e5   :  { %1456 = vmatpush3.bf16.msra.mxu1 %v1453_v36 }
 0x1e6   :  { %1458 = vmatprep.subr.bf16.mxu1 %v1457_v47 }
 0x1e9   :  { %1460 = vmatpush3.bf16.msra.mxu1 %v1457_v47 }
 0x29f   :  { %v1277_v7 = vpop.f32.mrb[16].mxu1 }
 0x2a0   :  { %v707_v56 = vpop.f32.mrb[17].mxu1  ;;  %v749_v10 = vadd.f32 %v1277_v7, %v745_v6 }
 0x2a1   :  { %v748_v8 = vadd.f32 %v744_v5, %v707_v56 }
 0x2a3   :  { %v1280_v11 = vpop.f32.mrb[18].mxu1  ;;  %1313 = vmatprep.mubr.f32.mxu1 %v748_v8 }
 0x2a4   :  { %v717_v12 = vpop.f32.mrb[19].mxu1  ;;  %1314 = vmatmul.mubr.f32.vlgmr.msra.gmra.mrb[20].mxu1 %v749_v10  ;;  %v751_v14 = vadd.f32 %v1280_v11, %v747_v57 }
 0x2a5   :  { %v750_v13 = vadd.f32 %v746_v9, %v717_v12 }
 0x2a7   :  { %1316 = vmatprep.mubr.f32.mxu1 %v750_v13 }
 0x2a8   :  { %1317 = vmatmul.mubr.f32.gmra.mrb[22].mxu1 %v751_v14 }
 0x377   :  { %v1315_v22 = vpop.f32.mrb[20].mxu1 }
 0x378   :  { %v847_v58 = vadd.f32 %v1315_v22, %v1041_v18  ;;  %v841_v25 = vpop.f32.mrb[21].mxu1 }
 0x379   :  { %v842_v19 = vadd.f32 %v1041_v18, %v841_v25 }
 0x37a   :  { %v861_v23 = vmax.f32 %v847_v58, 0.0 }
 0x37b   :  { %v860_v20 = vmax.f32 %v842_v19, 0.0  ;;  %v1318_v21 = vpop.f32.mrb[22].mxu1 }
 0x37c   :  { %v857_v59 = vadd.f32 %v1318_v21, %v1041_v18  ;;  %v851_v60 = vpop.f32.mrb[23].mxu1 }
 0x37d   :  { %v852_v24 = vadd.f32 %v1041_v18, %v851_v60  ;;  %1351 = vmatprep.mubr.f32.mxu0 %v860_v20 }
 0x37e   :  { %1352 = vmatmul.mubr.f32.vlgmr.msra.gmra.mrb[16].mxu0 %v861_v23  ;;  %v863_v27 = vmax.f32 %v857_v59, 0.0 }
 0x37f   :  { %v862_v26 = vmax.f32 %v852_v24, 0.0 }
 0x381   :  { %1354 = vmatprep.mubr.f32.mxu0 %v862_v26 }
 0x382   :  { %1355 = vmatmul.mubr.f32.gmra.mrb[18].mxu0 %v863_v27 }
 0x451   :  { %v1353_v29 = vpop.f32.mrb[16].mxu0 }
 0x452   :  { %v959_v42 = vadd.f32 %v1353_v29, %v1042_v28  ;;  %v953_v30 = vpop.f32.mrb[17].mxu0 }
 0x453   :  { %v954_v31 = vadd.f32 %v1042_v28, %v953_v30 }
 0x454   :  { %v973_v46 = vmax.f32 %v959_v42, 0.0 }
 0x455   :  { %v972_v32 = vmax.f32 %v954_v31, 0.0  ;;  %v1356_v33 = vpop.f32.mrb[18].mxu0 }
 0x456   :  { %977 = vst [vmem:[#allocation12 + $0x8] sm:$0xff] %v973_v46  ;;  %v969_v34 = vadd.f32 %v1356_v33, %v1042_v28  ;;  %v963_v35 = vpop.f32.mrb[19].mxu0 }
 0x457   :  { %976 = vst [vmem:[#allocation12] sm:$0xff] %v972_v32  ;;  %v964_v36 = vadd.f32 %v1042_v28, %v963_v35 }
 0x458   :  { %v975_v41 = vmax.f32 %v969_v34, 0.0 }
 0x459   :  { %v974_v45 = vmax.f32 %v964_v36, 0.0 }
 0x45a   :  { %979 = vst [vmem:[#allocation12 + $0x18] sm:$0xff] %v975_v41 }
 0x45b   :  { %978 = vst [vmem:[#allocation12 + $0x10] sm:$0xff] %v974_v45 }
 0x45c   :  { %1636 = shalt.err (!%p1633_p8)
}
 0x45d   :  { %s1637_s20 = scalar_lea.hbm %s2043_s11, 512 }
 0x45e   :  { %p1638_p9 = scmp.ne.s32.totalorder %s2043_s11, %s1637_s20  ;;  %p1641_p10 = scmp.lt.u32.totalorder %s1637_s20, %s2043_s11 }
 0x460   :  { %p1643_p11 = pnand %p1641_p10, %p1638_p9 }
 0x462   :  { %1646 = shalt.err (!%p1643_p11)
}
 0x463   :  { %991 = dma.vmem_to_hbm [thread:$0]  %s986_s16, 512, %s2043_s11, [#allocation6], %s1657_s29, %s1657_s29, %s1658_s30  }
 0x464   :  { %1653 = dma.done.wait [#allocation6], 512  }
 0x465   :  { %1654 = vsyncadd [#allocation6], 4294966784 }
 0x466   :  { %995 = vsyncpa [#allocation5], 1 }
 0x467   :  { %996 = vsyncpa [#allocation8], 1 }
 0x468   :  { %997 = vsyncpa [#allocation11], 1 }
 0x469   :  { %998 = vsyncpa [#allocation6], 1 }

</bundles_post_ra>
